<compile_context>
chip_gen: v5e
topology: v5e:2x2
jax: 0.10.0
libtpu: 0.0.40
codegen_flags: <defaults>
</compile_context>

<pallas_src>
import functools

import jax
import jax.numpy as jnp
from jax.experimental import pallas as pl
from jax.experimental.pallas import tpu as pltpu


_VMEM_BUDGET = 40 << 20         # usable by pipelined buffers; v7x-safe
_TARGET_BLOCK_BYTES = 8 << 20   # ~2-8 MiB blocks sit near the HBM roofline
_VMEM_LIMIT_CAP = 48 << 20


# ---------------------------------------------------------------------------
# Path 1: single-pass fused kernel (whole image(s) resident in VMEM)
# ---------------------------------------------------------------------------
def _se_fused_kernel(x_ref, w1t_ref, b1_ref, w2t_ref, b2_ref, o_ref):
    # x_ref: (TILE_N, C, HW); w1t: (C, Cr); b1: (1, Cr); w2t: (Cr, C); b2: (1, C)
    x = x_ref[...].astype(jnp.float32)

    # squeeze: global average pool over the flattened spatial (lane) axis
    pooled = jnp.mean(x, axis=-1)                                   # (TN, C)

    # excitation: fc1 (1x1 conv) + ReLU, fc2 (1x1 conv) + sigmoid, batched
    h = jnp.dot(pooled, w1t_ref[...],
                preferred_element_type=jnp.float32) + b1_ref[...]   # (TN, Cr)
    h = jnp.maximum(h, 0.0)
    g = jnp.dot(h, w2t_ref[...],
                preferred_element_type=jnp.float32) + b2_ref[...]   # (TN, C)
    g = jax.nn.sigmoid(g)

    # scale: per-(image, channel) gate broadcast over the spatial axis
    o_ref[...] = (x * g[:, :, None]).astype(o_ref.dtype)


# ---------------------------------------------------------------------------
# Path 2: two-pass fallback (feature map too large for single-pass VMEM)
# ---------------------------------------------------------------------------
def _se_gate_kernel(x_ref, w1_ref, b1_ref, w2_ref, b2_ref, s_ref, acc_ref,
                    *, hw_total, hw_tile):
    """Pass A: accumulate spatial sum over HW tiles, emit gate (C, 1)."""
    hw_i = pl.program_id(1)

    @pl.when(hw_i == 0)
    def _():
        acc_ref[...] = jnp.zeros_like(acc_ref)

    x = x_ref[0].astype(jnp.float32)                                # (C, THW)
    col = jax.lax.broadcasted_iota(jnp.int32, x.shape, 1) + hw_i * hw_tile
    x = jnp.where(col < hw_total, x, 0.0)       # mask partial last HW tile
    acc_ref[...] += jnp.sum(x, axis=-1, keepdims=True)              # (C, 1)

    @pl.when(hw_i == pl.num_programs(1) - 1)
    def _():
        pooled = acc_ref[...] * (1.0 / hw_total)                    # (C, 1)
        h = jnp.dot(w1_ref[...], pooled,
                    preferred_element_type=jnp.float32) + b1_ref[...]
        h = jnp.maximum(h, 0.0)
        g = jnp.dot(w2_ref[...], h,
                    preferred_element_type=jnp.float32) + b2_ref[...]
        s_ref[0] = jax.nn.sigmoid(g)                                # (C, 1)


def _se_scale_kernel(x_ref, s_ref, o_ref):
    """Pass B: stream x and multiply by the per-channel gate."""
    x = x_ref[0].astype(jnp.float32)                                # (C, THW)
    o_ref[0] = (x * s_ref[0]).astype(o_ref.dtype)


# ---------------------------------------------------------------------------
# Wrapper
# ---------------------------------------------------------------------------
def se_module(x_nchw, w1, b1, w2, b2, *, two_pass=None, hw_tile=None,
              in_place=False):
    """SEModule forward.  x_nchw: (N,C,H,W); w1: (Cr,C); b1: (Cr,);
    w2: (C,Cr); b2: (C,).  Returns (N,C,H,W) in x's dtype."""
    N, C, H, W = x_nchw.shape
    HW = H * W
    Cr = w1.shape[0]
    dt = x_nchw.dtype
    itemsize = x_nchw.dtype.itemsize
    x = x_nchw.reshape(N, C, HW)

    w1 = w1.astype(jnp.float32)
    b1 = b1.astype(jnp.float32)
    w2 = w2.astype(jnp.float32)
    b2 = b2.astype(jnp.float32)

    per_image_bytes = C * HW * itemsize
    if two_pass is None:
        # single pass needs (2 in + 2 out) double-buffered image blocks in VMEM
        two_pass = 4 * per_image_bytes > _VMEM_BUDGET

    alias = {"input_output_aliases": {0: 0}} if in_place else {}

    if not two_pass:
        tile_n = int(max(1, min(N, _TARGET_BLOCK_BYTES // per_image_bytes)))
        block_bytes = tile_n * per_image_bytes
        vmem_limit = int(min(_VMEM_LIMIT_CAP,
                             max(16 << 20, 4 * block_bytes + (4 << 20))))
        out = pl.pallas_call(
            _se_fused_kernel,
            out_shape=jax.ShapeDtypeStruct((N, C, HW), dt),
            grid_spec=pltpu.PrefetchScalarGridSpec(
                num_scalar_prefetch=0,
                grid=(pl.cdiv(N, tile_n),),
                in_specs=[
                    pl.BlockSpec((tile_n, C, HW), lambda n: (n, 0, 0)),
                    pl.BlockSpec((C, Cr), lambda n: (0, 0)),
                    pl.BlockSpec((1, Cr), lambda n: (0, 0)),
                    pl.BlockSpec((Cr, C), lambda n: (0, 0)),
                    pl.BlockSpec((1, C), lambda n: (0, 0)),
                ],
                out_specs=pl.BlockSpec((tile_n, C, HW), lambda n: (n, 0, 0)),
            ),
            compiler_params=pltpu.CompilerParams(
                dimension_semantics=("parallel",),
                vmem_limit_bytes=vmem_limit),
            **alias,
        )(x, w1.T, b1.reshape(1, Cr), w2.T, b2.reshape(1, C))
        return out.reshape(N, C, H, W)

    # -------- two-pass fallback --------
    if hw_tile is None:
        max_thw = max(1, _TARGET_BLOCK_BYTES // (C * itemsize))
        hw_tile = HW if max_thw >= HW else max(128, (max_thw // 128) * 128)
    hw_tile = int(min(hw_tile, HW))
    n_hw = pl.cdiv(HW, hw_tile)
    block_bytes = C * hw_tile * itemsize
    vmem_limit = int(min(_VMEM_LIMIT_CAP,
                         max(16 << 20, 4 * block_bytes + (4 << 20))))

    gate = pl.pallas_call(
        functools.partial(_se_gate_kernel, hw_total=HW, hw_tile=hw_tile),
        out_shape=jax.ShapeDtypeStruct((N, C, 1), jnp.float32),
        grid_spec=pltpu.PrefetchScalarGridSpec(
            num_scalar_prefetch=0,
            grid=(N, n_hw),
            in_specs=[
                pl.BlockSpec((1, C, hw_tile), lambda n, k: (n, 0, k)),
                pl.BlockSpec((Cr, C), lambda n, k: (0, 0)),
                pl.BlockSpec((Cr, 1), lambda n, k: (0, 0)),
                pl.BlockSpec((C, Cr), lambda n, k: (0, 0)),
                pl.BlockSpec((C, 1), lambda n, k: (0, 0)),
            ],
            out_specs=pl.BlockSpec((1, C, 1), lambda n, k: (n, 0, 0)),
            scratch_shapes=[pltpu.VMEM((C, 1), jnp.float32)],
        ),
        compiler_params=pltpu.CompilerParams(
            dimension_semantics=("parallel", "arbitrary"),
            vmem_limit_bytes=vmem_limit),
    )(x, w1, b1.reshape(Cr, 1), w2, b2.reshape(C, 1))

    out = pl.pallas_call(
        _se_scale_kernel,
        out_shape=jax.ShapeDtypeStruct((N, C, HW), dt),
        grid_spec=pltpu.PrefetchScalarGridSpec(
            num_scalar_prefetch=0,
            grid=(N, n_hw),
            in_specs=[
                pl.BlockSpec((1, C, hw_tile), lambda n, k: (n, 0, k)),
                pl.BlockSpec((1, C, 1), lambda n, k: (n, 0, 0)),
            ],
            out_specs=pl.BlockSpec((1, C, hw_tile), lambda n, k: (n, 0, k)),
        ),
        compiler_params=pltpu.CompilerParams(
            dimension_semantics=("parallel", "parallel"),
            vmem_limit_bytes=vmem_limit),
        **alias,
    )(x, gate)
    return out.reshape(N, C, H, W)


def se_module_ref(x, w1, b1, w2, b2):
    """Pure-JAX reference matching the PyTorch forward."""
    pooled = jnp.mean(x, axis=(2, 3), keepdims=True)                # (N,C,1,1)
    h = jnp.einsum('rc,nchw->nrhw', w1, pooled) + b1[None, :, None, None]
    h = jnp.maximum(h, 0.0)
    s = jnp.einsum('cr,nrhw->nchw', w2, h) + b2[None, :, None, None]
    s = jax.nn.sigmoid(s)
    return x * s


if __name__ == "__main__":
    key = jax.random.PRNGKey(0)

    def make_params(k, C, reduction):
        Cr = max(1, C // reduction)
        k1, k2, k3, k4 = jax.random.split(k, 4)
        w1 = 0.1 * jax.random.normal(k1, (Cr, C), jnp.float32)
        b1 = 0.1 * jax.random.normal(k2, (Cr,), jnp.float32)
        w2 = 0.1 * jax.random.normal(k3, (C, Cr), jnp.float32)
        b2 = 0.1 * jax.random.normal(k4, (C,), jnp.float32)
        return w1, b1, w2, b2

    # --- test 1: single-pass fused path (images batched into one block) ---
    N, C, H, W = 2, 32, 16, 16
    kx, kp = jax.random.split(key)
    x = jax.random.normal(kx, (N, C, H, W), jnp.float32)
    w1, b1, w2, b2 = make_params(kp, C, reduction=16)
    out = jax.block_until_ready(se_module(x, w1, b1, w2, b2))
    ref = se_module_ref(x, w1, b1, w2, b2)
    assert out.shape == (N, C, H, W)
    assert jnp.allclose(out, ref, atol=1e-4, rtol=1e-4), "single-pass mismatch"

    # --- test 2: non-128-aligned HW (7x7) and non-8-aligned C ---
    N2, C2, H2, W2 = 3, 20, 7, 7
    kx2, kp2 = jax.random.split(kp)
    x2 = jax.random.normal(kx2, (N2, C2, H2, W2), jnp.float32)
    w1a, b1a, w2a, b2a = make_params(kp2, C2, reduction=4)
    out2 = jax.block_until_ready(se_module(x2, w1a, b1a, w2a, b2a))
    ref2 = se_module_ref(x2, w1a, b1a, w2a, b2a)
    assert jnp.allclose(out2, ref2, atol=1e-4, rtol=1e-4), "unaligned mismatch"

    # --- test 3: forced two-pass fallback; partial HW tile exercises masking ---
    N3, C3, H3, W3 = 2, 32, 14, 14          # HW=196, hw_tile=128 -> partial tile
    kx3, kp3 = jax.random.split(kp2)
    x3 = jax.random.normal(kx3, (N3, C3, H3, W3), jnp.float32)
    w1b, b1b, w2b, b2b = make_params(kp3, C3, reduction=16)
    out3 = jax.block_until_ready(
        se_module(x3, w1b, b1b, w2b, b2b, two_pass=True, hw_tile=128))
    ref3 = se_module_ref(x3, w1b, b1b, w2b, b2b)
    assert jnp.allclose(out3, ref3, atol=1e-4, rtol=1e-4), "two-pass mismatch"

    # --- test 4: bf16 I/O (halves HBM bytes; compute stays f32 in-kernel) ---
    out4 = jax.block_until_ready(se_module(x.astype(jnp.bfloat16), w1, b1, w2, b2))
    assert out4.dtype == jnp.bfloat16
    assert jnp.allclose(out4.astype(jnp.float32), ref, atol=5e-2, rtol=5e-2), \
        "bf16 mismatch"

    # --- test 5: in-place variant (output aliases x's HBM buffer) ---
    x_copy = x + 0.0                         # disposable buffer (treated as donated)
    out5 = jax.block_until_ready(se_module(x_copy, w1, b1, w2, b2, in_place=True))
    assert jnp.allclose(out5, ref, atol=1e-4, rtol=1e-4), "in-place mismatch"

    print("KERNEL_OK")
</pallas_src>

<mosaic_0001>
module attributes {stable_mosaic.version = 11 : i64} {
  func.func @_se_fused_kernel(%arg0: i32, %arg1: memref<2x32x256xf32, #tpu.memory_space<vmem>>, %arg2: memref<32x2xf32, #tpu.memory_space<vmem>>, %arg3: memref<1x2xf32, #tpu.memory_space<vmem>>, %arg4: memref<2x32xf32, #tpu.memory_space<vmem>>, %arg5: memref<1x32xf32, #tpu.memory_space<vmem>>, %arg6: memref<2x32x256xf32, #tpu.memory_space<vmem>>) attributes {dimension_semantics = [#tpu.dimension_semantics<parallel>], iteration_bounds = array<i64: 1>, scalar_prefetch = 0 : i64, scratch_operands = 0 : i64, tpu.core_type = #tpu.core_type<tc>, window_params = [{transform_indices = @transform_0, window_bounds = array<i64: 2, 32, 256>}, {pipeline_mode = #tpu.pipeline_mode<synchronous>, transform_indices = @transform_1, window_bounds = array<i64: 32, 2>}, {pipeline_mode = #tpu.pipeline_mode<synchronous>, transform_indices = @transform_2, window_bounds = array<i64: 1, 2>}, {pipeline_mode = #tpu.pipeline_mode<synchronous>, transform_indices = @transform_3, window_bounds = array<i64: 2, 32>}, {pipeline_mode = #tpu.pipeline_mode<synchronous>, transform_indices = @transform_4, window_bounds = array<i64: 1, 32>}, {transform_indices = @transform_5, window_bounds = array<i64: 2, 32, 256>}]} {
    %c0 = arith.constant 0 : index
    %c0_0 = arith.constant 0 : index
    %c0_1 = arith.constant 0 : index
    %0 = vector.load %arg1[%c0, %c0_0, %c0_1] : memref<2x32x256xf32, #tpu.memory_space<vmem>>, vector<2x32x256xf32>
    %cst = arith.constant dense<0.000000e+00> : vector<2x32xf32>
    %1 = vector.multi_reduction <add>, %0, %cst [2] : vector<2x32x256xf32> to vector<2x32xf32>
    %cst_2 = arith.constant 2.560000e+02 : f32
    %2 = vector.broadcast %cst_2 : f32 to vector<2x32xf32>
    %3 = arith.divf %1, %2 : vector<2x32xf32>
    %c0_3 = arith.constant 0 : index
    %c0_4 = arith.constant 0 : index
    %4 = vector.load %arg2[%c0_3, %c0_4] : memref<32x2xf32, #tpu.memory_space<vmem>>, vector<32x2xf32>
    %cst_5 = arith.constant dense<0.000000e+00> : vector<2x2xf32>
    %5 = tpu.matmul %3, %4, %cst_5 {dimension_numbers = #tpu.dot_dimension_numbers<[1], [0], [0], [1], [0, 0, 1, 1], [], []>} : vector<2x32xf32>, vector<32x2xf32>, vector<2x2xf32> -> vector<2x2xf32>
    %c0_6 = arith.constant 0 : index
    %c0_7 = arith.constant 0 : index
    %6 = vector.load %arg3[%c0_6, %c0_7] : memref<1x2xf32, #tpu.memory_space<vmem>>, vector<1x2xf32>
    %7 = vector.broadcast %6 : vector<1x2xf32> to vector<2x2xf32>
    %8 = arith.addf %5, %7 : vector<2x2xf32>
    %cst_8 = arith.constant 0.000000e+00 : f32
    %9 = vector.broadcast %cst_8 : f32 to vector<2x2xf32>
    %10 = arith.maximumf %8, %9 : vector<2x2xf32>
    %c0_9 = arith.constant 0 : index
    %c0_10 = arith.constant 0 : index
    %11 = vector.load %arg4[%c0_9, %c0_10] : memref<2x32xf32, #tpu.memory_space<vmem>>, vector<2x32xf32>
    %cst_11 = arith.constant dense<0.000000e+00> : vector<2x32xf32>
    %12 = tpu.matmul %10, %11, %cst_11 {dimension_numbers = #tpu.dot_dimension_numbers<[1], [0], [0], [1], [0, 0, 1, 1], [], []>} : vector<2x2xf32>, vector<2x32xf32>, vector<2x32xf32> -> vector<2x32xf32>
    %c0_12 = arith.constant 0 : index
    %c0_13 = arith.constant 0 : index
    %13 = vector.load %arg5[%c0_12, %c0_13] : memref<1x32xf32, #tpu.memory_space<vmem>>, vector<1x32xf32>
    %14 = vector.broadcast %13 : vector<1x32xf32> to vector<2x32xf32>
    %15 = arith.addf %12, %14 : vector<2x32xf32>
    %16 = arith.negf %15 : vector<2x32xf32>
    %17 = math.exp %16 : vector<2x32xf32>
    %cst_14 = arith.constant 1.000000e+00 : f32
    %18 = vector.broadcast %cst_14 : f32 to vector<2x32xf32>
    %19 = arith.addf %18, %17 : vector<2x32xf32>
    %20 = arith.divf %18, %19 : vector<2x32xf32>
    %21 = vector.shape_cast %20 : vector<2x32xf32> to vector<2x32x1xf32>
    %22 = vector.broadcast %21 : vector<2x32x1xf32> to vector<2x32x256xf32>
    %23 = arith.mulf %0, %22 : vector<2x32x256xf32>
    %c0_15 = arith.constant 0 : index
    %c0_16 = arith.constant 0 : index
    %c0_17 = arith.constant 0 : index
    %24 = vector.load %arg6[%c0_15, %c0_16, %c0_17] : memref<2x32x256xf32, #tpu.memory_space<vmem>>, vector<2x32x256xf32>
    tpu.vector_store %arg6[%c0_15, %c0_16, %c0_17], %23 {strides = array<i32>} : memref<2x32x256xf32, #tpu.memory_space<vmem>>, vector<2x32x256xf32>,
    return
  }
  func.func @transform_0(%arg0: i32) -> (i32, i32, i32) {
    %c0_i32 = arith.constant 0 : i32
    %c0_i32_0 = arith.constant 0 : i32
    %c0_i32_1 = arith.constant 0 : i32
    return %arg0, %c0_i32, %c0_i32_0 : i32, i32, i32
  }
  func.func @transform_1(%arg0: i32) -> (i32, i32) {
    %c0_i32 = arith.constant 0 : i32
    %c0_i32_0 = arith.constant 0 : i32
    %c0_i32_1 = arith.constant 0 : i32
    return %c0_i32, %c0_i32_0 : i32, i32
  }
  func.func @transform_2(%arg0: i32) -> (i32, i32) {
    %c0_i32 = arith.constant 0 : i32
    %c0_i32_0 = arith.constant 0 : i32
    %c0_i32_1 = arith.constant 0 : i32
    return %c0_i32, %c0_i32_0 : i32, i32
  }
  func.func @transform_3(%arg0: i32) -> (i32, i32) {
    %c0_i32 = arith.constant 0 : i32
    %c0_i32_0 = arith.constant 0 : i32
    %c0_i32_1 = arith.constant 0 : i32
    return %c0_i32, %c0_i32_0 : i32, i32
  }
  func.func @transform_4(%arg0: i32) -> (i32, i32) {
    %c0_i32 = arith.constant 0 : i32
    %c0_i32_0 = arith.constant 0 : i32
    %c0_i32_1 = arith.constant 0 : i32
    return %c0_i32, %c0_i32_0 : i32, i32
  }
  func.func @transform_5(%arg0: i32) -> (i32, i32, i32) {
    %c0_i32 = arith.constant 0 : i32
    %c0_i32_0 = arith.constant 0 : i32
    %c0_i32_1 = arith.constant 0 : i32
    return %arg0, %c0_i32, %c0_i32_0 : i32, i32, i32
  }
}

</mosaic_0001>

<bundles_post_ra>
// kernel: tpu_custom_call.1
= control target key start
LH: loop header
LB: loop body
LE: loop exit
PB: predicated region body
PF: predicated region fallthrough
CT: control target
= control target key end

     0   :  { %10 = vsyncpa [#allocation3], 0  ;;  %s519_s0 = inlined_call_operand.hbm [shape: f32[2,32,256], index: 0, kind: input, shape index: {}]   ;;  %s520_s1 = inlined_call_operand.vmem [shape: f32[32,2], index: 1, kind: input, shape index: {}]   ;;  %s521_s2 = inlined_call_operand.vmem [shape: f32[1,2], index: 2, kind: input, shape index: {}]   ;;  %s522_s3 = inlined_call_operand.vmem [shape: f32[2,32], index: 3, kind: input, shape index: {}]   ;;  %s523_s4 = inlined_call_operand.vmem [shape: f32[1,32], index: 4, kind: input, shape index: {}]   ;;  %s524_s5 = inlined_call_operand.hbm [shape: f32[2,32,256], index: 5, kind: output, shape index: {}]  }
   0x1   :  { %11 = vsyncpa [#allocation4], 0  ;;  %s16_s20 = sshll.u32 %s519_s0, 4  ;;  %s387_s21 = smov [#allocation2]   ;;  %s17_s20 = int_to_ptr.hbm [resolvable:$true] %s16_s20 }
   0x2   :  { %s18_s22 = sshll.u32 %s387_s21, 4  ;;  %s388_s23 = smov 256   ;;  %s19_s22 = int_to_ptr.vmem [resolvable:$true] %s18_s22 }
   0x3   :  { %s389_s24 = smov 16  }
   0x4   :  { %24 = dma.hbm_to_vmem [thread:$0]  %s17_s20, 2048, %s19_s22, [#allocation3], %s388_s23, %s388_s23, %s389_s24  }
   0x5   :  { %383 = dma.done.wait [#allocation3], 2048  }
   0x6   :  { %384 = vsyncadd [#allocation3], 4294965248  ;;  %v428_v0 = vld [vmem:[#allocation2 + $0x40] sm:$0xff]  ;;  %v430_v1 = vld [vmem:[#allocation2 + $0x48] sm:$0xff]  ;;  %v390_v25 = vmov 256.0   ;;  %v108_v36 = vlaneseq  ;;  %vm113_vm1 = vcmask 130112  }
   0x7   :  { %v432_v2 = vld [vmem:[#allocation2] sm:$0xff]  ;;  %v65_v3 = vadd.f32 %v430_v1, %v428_v0  ;;  %v436_v4 = vld [vmem:[#allocation2 + $0x8] sm:$0xff]  ;;  %v446_v9 = vld [vmem:[#allocation2 + $0x50] sm:$0xff]  ;;  %329 = vrcp.f32 %v390_v25  ;;  %vm117_vm2 = vcmask 195712   ;;  %vm121_vm3 = vcmask 261312   ;;  %s296_s13 = sshll.u32 %s524_s5, 4  ;;  %s297_s13 = int_to_ptr.hbm [resolvable:$true] %s296_s13 }
   0x8   :  { %v438_v5 = vld [vmem:[#allocation2 + $0x20] sm:$0xff]  ;;  %v440_v6 = vld [vmem:[#allocation2 + $0x28] sm:$0xff]  ;;  %v53_v7 = vadd.f32 %v436_v4, %v432_v2  ;;  %v448_v10 = vld [vmem:[#allocation2 + $0x58] sm:$0xff]  ;;  %v109_v38 = vand.u32 127, %v108_v36  ;;  %vm130_vm4 = vcmask 1041409   ;;  %vm132_vm5 = vcmask 261120  }
   0x9   :  { %v59_v8 = vadd.f32 %v440_v6, %v438_v5  ;;  %66 = vadd.xlane.f32.xlu1 %v65_v3  ;;  %v450_v11 = vld [vmem:[#allocation2 + $0x10] sm:$0xff]  ;;  %v452_v12 = vld [vmem:[#allocation2 + $0x18] sm:$0xff]  ;;  %v454_v13 = vld [vmem:[#allocation2 + $0x60] sm:$0xff]  ;;  %v68_v15 = vadd.f32 %v448_v10, %v446_v9  ;;  %vm165_vm6 = vcmask 1041408   ;;  %vm161_vm7 = vcmask 15360  }
   0xa   :  { %54 = vadd.xlane.f32.xlu0 %v53_v7  ;;  %v456_v14 = vld [vmem:[#allocation2 + $0x68] sm:$0xff]  ;;  %v56_v16 = vadd.f32 %v452_v12, %v450_v11  ;;  %v464_v18 = vld [vmem:[#allocation2 + $0x70] sm:$0xff]  ;;  %v466_v19 = vld [vmem:[#allocation2 + $0x78] sm:$0xff]  ;;  %v111_v41 = vadd.s32 4294967288, %v109_v38  ;;  %v115_v50 = vadd.s32 4294967280, %v109_v38  ;;  %v119_v54 = vadd.s32 4294967272, %v109_v38 }
   0xb   :  { %60 = vadd.xlane.f32.xlu2 %v59_v8  ;;  %v71_v17 = vadd.f32 %v456_v14, %v454_v13  ;;  %v468_v20 = vld [vmem:[#allocation2 + $0x30] sm:$0xff]  ;;  %v470_v21 = vld [vmem:[#allocation2 + $0x38] sm:$0xff]  ;;  %v74_v22 = vadd.f32 %v466_v19, %v464_v18  ;;  %v93_v27 = vld [vmem:[%s520_s1 + $0x8] sm:$0xff] }
   0xc   :  { %v62_v23 = vadd.f32 %v470_v21, %v468_v20  ;;  %v95_v24 = vld [vmem:[%s520_s1 + $0x18] sm:$0xff]  ;;  %v94_v26 = vld [vmem:[%s520_s1 + $0x10] sm:$0xff]  ;;  %v92_v28 = vld [vmem:[%s520_s1] sm:$0xff] }
   0xd   :  { %147 = vmatpush.msra.mxu0 %v95_v24  ;;  %v330_v29 = vpop.eup %329  ;;  %v327_v24 = vld [vmem:[%s521_s2] ss:$0 sm:$0xff]  ;;  %s391_s2 = smov [#allocation5]  }
   0xe   :  { %v78_v30 = vmul.f32 256.0, %v330_v29  ;;  %vm82_vm0 = vweird.f32 %v330_v29 }
   0xf   :  { %148 = vmatpush.msra.mxu0 %v94_v26 }
  0x10   :  { %v79_v31 = vsub.f32 1.0, %v78_v30 }
  0x11   :  { %69 = vadd.xlane.f32.xlu1 %v68_v15  ;;  %149 = vmatpush.msra.mxu0 %v93_v27 }
  0x12   :  { %57 = vadd.xlane.f32.xlu0 %v56_v16  ;;  %v80_v32 = vmul.f32 %v330_v29, %v79_v31  ;;  %v328_v31 = vld [vmem:[%s523_s4] ss:$0 sm:$0xff] }
  0x13   :  { %72 = vadd.xlane.f32.xlu2 %v71_v17  ;;  %150 = vmatpush.msra.mxu0 %v92_v28  ;;  %v210_v28 = vshrl.u32 %v108_v36, 7 }
  0x14   :  { %v81_v37 = vadd.f32 %v330_v29, %v80_v32 }
  0x15   :  { %318 = vset.pattern.permute.xlu2 %v210_v28  ;;  %v217_v30 = vadd.s32 8, %v210_v28 }
  0x16   :  { %v83_v39 = vsel %vm82_vm0, %v330_v29, %v81_v37  ;;  %v223_v29 = vadd.s32 16, %v210_v28 }
  0x17   :  { %319 = vset.pattern.permute.xlu0 %v217_v30 }
  0x18   :  { %320 = vset.pattern.permute.xlu1 %v223_v29 }
  0x19   :  { %75 = vadd.xlane.f32.xlu1 %v74_v22 }
  0x1a   :  { %63 = vadd.xlane.f32.xlu0 %v62_v23  ;;  %v156_v23 = vld [vmem:[%s522_s3] sm:$0x3]  ;;  %s294_s3 = sshll.u32 %s391_s2, 4  ;;  %s295_s3 = int_to_ptr.vmem [resolvable:$true] %s294_s3 }
  0x1b   :  { %310 = vmatpush.msk.msra.mxu1 %vm165_vm6, %v156_v23 }
  0x7c   :  { %v67_v33 = vpop.xlane.xlu1 %66 }
  0x7d   :  { %v55_v34 = vpop.xlane.xlu0 %54  ;;  %v88_v46 = vmul.f32 %v83_v39, %v67_v33 }
  0x7e   :  { %v61_v35 = vpop.xlane.xlu2 %60  ;;  %v84_v47 = vmul.f32 %v83_v39, %v55_v34 }
  0x7f   :  { %v123_v52 = vperm.slane %v88_v46, %v109_v38  ;;  %v86_v53 = vmul.f32 %v83_v39, %v61_v35 }
  0x80   :  { %v110_v55 = vperm.slane %v84_v47, %v109_v38 }
  0x81   :  { %v116_v63 = vperm.slane %v86_v53, %v115_v50 }
  0x84   :  { %v70_v40 = vpop.xlane.xlu1 %69 }
  0x85   :  { %v89_v42 = vmul.f32 %v83_v39, %v70_v40  ;;  %v58_v43 = vpop.xlane.xlu0 %57 }
  0x86   :  { %v73_v44 = vpop.xlane.xlu2 %72  ;;  %v85_v45 = vmul.f32 %v83_v39, %v58_v43 }
  0x87   :  { %v90_v48 = vmul.f32 %v83_v39, %v73_v44  ;;  %v124_v49 = vperm.slane %v89_v42, %v111_v41 }
  0x88   :  { %v112_v51 = vperm.slane %v85_v45, %v111_v41 }
  0x89   :  { %v126_v56 = vperm.slane %v90_v48, %v115_v50  ;;  %v125_v58 = vsel %vm113_vm1, %v124_v49, %v123_v52  ;;  %v229_v48 = vadd.s32 24, %v210_v28 }
  0x8a   :  { %v114_v61 = vsel %vm113_vm1, %v112_v51, %v110_v55 }
  0x8b   :  { %v127_v8 = vsel %vm117_vm2, %v126_v56, %v125_v58  ;;  %v118_v15 = vsel %vm117_vm2, %v116_v63, %v114_v61 }
  0x8c   :  { %v76_v57 = vpop.xlane.xlu1 %75 }
  0x8d   :  { %v91_v59 = vmul.f32 %v83_v39, %v76_v57  ;;  %v64_v60 = vpop.xlane.xlu0 %63 }
  0x8e   :  { %v87_v62 = vmul.f32 %v83_v39, %v64_v60 }
  0x8f   :  { %v128_v3 = vperm.slane %v91_v59, %v119_v54 }
  0x90   :  { %v120_v7 = vperm.slane %v87_v62, %v119_v54 }
  0x91   :  { %v129_v16 = vsel %vm121_vm3, %v128_v3, %v127_v8 }
  0x92   :  { %v122_v17 = vsel %vm121_vm3, %v120_v7, %v118_v15 }
  0x93   :  { %v131_v22 = vsel %vm130_vm4, %v129_v16, %v122_v17 }
  0x94   :  { %309 = vmatmul.msk.f32.vlgmr.msra.gmra.mxu0 %vm132_vm5, %v131_v22 }
 0x111   :  { %v152_v25 = vpop.f32.mrf.mxu0 }
 0x112   :  { %v153_v26 = vadd.f32 %v327_v24, %v152_v25 }
 0x114   :  { %v155_v27 = vmax.f32 %v153_v26, 0.0 }
 0x116   :  { %311 = vmatmul.msk.f32.vlgmr.msra.gmra.mxu1 %vm161_vm7, %v155_v27 }
 0x193   :  { %v186_v32 = vpop.f32.mrf.mxu1 }
 0x194   :  { %v187_v33 = vadd.f32 %v328_v31, %v186_v32 }
 0x196   :  { %v312_v34 = vmul.f32 -1.442695, %v187_v33 }
 0x198   :  { %331 = vpow2.f32 %v312_v34 }
 0x19e   :  { %v332_v35 = vpop.eup %331 }
 0x19f   :  { %v192_v37 = vadd.f32 1.0, %v332_v35 }
 0x1a1   :  { %333 = vrcp.f32 %v192_v37  ;;  %v204_v36 = vand.u32 2147483648, %v192_v37  ;;  %v202_v42 = vand.u32 2147483647, %v192_v37  ;;  %vm198_vm9 = vweird.f32 %v192_v37 }
 0x1a3   :  { %v205_v44 = vor.u32 1.1754944e-38, %v204_v36  ;;  %vm203_vm11 = vcmp.eq.f32.partialorder %v202_v42, 8.507059e+37 }
 0x1a7   :  { %v334_v38 = vpop.eup %333 }
 0x1a8   :  { %v194_v39 = vmul.f32 %v334_v38, %v192_v37  ;;  %vm199_vm8 = vweird.f32 %v334_v38 }
 0x1a9   :  { %vm200_vm10 = vmor %vm198_vm9, %vm199_vm8 }
 0x1aa   :  { %v195_v40 = vsub.f32 1.0, %v194_v39 }
 0x1ac   :  { %v196_v41 = vmul.f32 %v334_v38, %v195_v40 }
 0x1ae   :  { %v197_v43 = vadd.f32 %v334_v38, %v196_v41 }
 0x1b0   :  { %v201_v45 = vsel %vm200_vm10, %v334_v38, %v197_v43 }
 0x1b1   :  { %v206_v46 = vsel %vm203_vm11, %v205_v44, %v201_v45 }
 0x1b2   :  { %v208_v47 = vperm.slane %v206_v46, 0  ;;  %v233_v49 = vperm.slane %v206_v46, 1 }
 0x1b4   :  { %225 = vperm.xlu1 %320, %v208_v47   ;;  %219 = vperm.xlu0 %319, %v208_v47  }
 0x1b5   :  { %213 = vperm.xlu2 %318, %v208_v47  }
 0x1bc   :  { %323 = vset.pattern.permute.xlu1 %v217_v30  ;;  %326 = vset.pattern.permute.xlu0 %v229_v48 }
 0x1bd   :  { %321 = vset.pattern.permute.xlu2 %v229_v48 }
 0x1c4   :  { %244 = vperm.xlu1 %323, %v233_v49  }
 0x1c5   :  { %231 = vperm.xlu2 %321, %v208_v47  }
 0x1cc   :  { %325 = vset.pattern.permute.xlu1 %v229_v48 }
 0x1cd   :  { %322 = vset.pattern.permute.xlu2 %v210_v28 }
 0x1d4   :  { %256 = vperm.xlu1 %325, %v233_v49  }
 0x1d5   :  { %238 = vperm.xlu2 %322, %v233_v49  }
 0x1dd   :  { %324 = vset.pattern.permute.xlu2 %v223_v29 }
 0x1e5   :  { %250 = vperm.xlu2 %324, %v233_v49  }
 0x20f   :  { %v214_v50 = vpop.permute.xlu2 %213 }
 0x210   :  { %v258_v51 = vmul.f32 %v214_v50, %v432_v2  ;;  %v259_v52 = vmul.f32 %v214_v50, %v436_v4 }
 0x212   :  { %274 = vst [vmem:[#allocation5] sm:$0xff] %v258_v51 }
 0x213   :  { %275 = vst [vmem:[#allocation5 + $0x8] sm:$0xff] %v259_v52 }
 0x21f   :  { %v232_v53 = vpop.permute.xlu2 %231 }
 0x220   :  { %v264_v54 = vmul.f32 %v232_v53, %v468_v20  ;;  %v265_v55 = vmul.f32 %v232_v53, %v470_v21 }
 0x222   :  { %280 = vst [vmem:[#allocation5 + $0x30] sm:$0xff] %v264_v54 }
 0x223   :  { %281 = vst [vmem:[#allocation5 + $0x38] sm:$0xff] %v265_v55 }
 0x226   :  { %v226_v56 = vpop.permute.xlu1 %225  ;;  %v220_v57 = vpop.permute.xlu0 %219 }
 0x227   :  { %v262_v58 = vmul.f32 %v226_v56, %v438_v5  ;;  %v263_v59 = vmul.f32 %v226_v56, %v440_v6  ;;  %v260_v60 = vmul.f32 %v220_v57, %v450_v11  ;;  %v261_v2 = vmul.f32 %v220_v57, %v452_v12 }
 0x229   :  { %278 = vst [vmem:[#allocation5 + $0x20] sm:$0xff] %v262_v58 }
 0x22a   :  { %279 = vst [vmem:[#allocation5 + $0x28] sm:$0xff] %v263_v59 }
 0x22b   :  { %276 = vst [vmem:[#allocation5 + $0x10] sm:$0xff] %v260_v60 }
 0x22c   :  { %277 = vst [vmem:[#allocation5 + $0x18] sm:$0xff] %v261_v2 }
 0x22f   :  { %v239_v4 = vpop.permute.xlu2 %238 }
 0x230   :  { %v266_v20 = vmul.f32 %v239_v4, %v428_v0  ;;  %v267_v21 = vmul.f32 %v239_v4, %v430_v1 }
 0x232   :  { %282 = vst [vmem:[#allocation5 + $0x40] sm:$0xff] %v266_v20 }
 0x233   :  { %283 = vst [vmem:[#allocation5 + $0x48] sm:$0xff] %v267_v21 }
 0x236   :  { %v245_v61 = vpop.permute.xlu1 %244 }
 0x237   :  { %v268_v5 = vmul.f32 %v245_v61, %v446_v9  ;;  %v269_v6 = vmul.f32 %v245_v61, %v448_v10 }
 0x239   :  { %284 = vst [vmem:[#allocation5 + $0x50] sm:$0xff] %v268_v5 }
 0x23a   :  { %285 = vst [vmem:[#allocation5 + $0x58] sm:$0xff] %v269_v6 }
 0x23f   :  { %v251_v11 = vpop.permute.xlu2 %250 }
 0x240   :  { %v270_v12 = vmul.f32 %v251_v11, %v454_v13  ;;  %v271_v62 = vmul.f32 %v251_v11, %v456_v14 }
 0x242   :  { %286 = vst [vmem:[#allocation5 + $0x60] sm:$0xff] %v270_v12 }
 0x243   :  { %287 = vst [vmem:[#allocation5 + $0x68] sm:$0xff] %v271_v62 }
 0x246   :  { %v257_v0 = vpop.permute.xlu1 %256 }
 0x247   :  { %v272_v1 = vmul.f32 %v257_v0, %v464_v18  ;;  %v273_v9 = vmul.f32 %v257_v0, %v466_v19 }
 0x249   :  { %288 = vst [vmem:[#allocation5 + $0x70] sm:$0xff] %v272_v1 }
 0x24a   :  { %289 = vst [vmem:[#allocation5 + $0x78] sm:$0xff] %v273_v9 }
 0x24b   :  { %302 = dma.vmem_to_hbm [thread:$0]  %s295_s3, 2048, %s297_s13, [#allocation4], %s388_s23, %s388_s23, %s389_s24  }
 0x24c   :  { %385 = dma.done.wait [#allocation4], 2048  }
 0x24d   :  { %386 = vsyncadd [#allocation4], 4294965248 }
 0x24e   :  { %307 = vsyncpa [#allocation3], 1 }
 0x24f   :  { %308 = vsyncpa [#allocation4], 1 }

</bundles_post_ra>
